<compile_context>
chip_gen: v6e
topology: v6e:2x2x1
jax: 0.10.0
libtpu: 0.0.40
codegen_flags: <defaults>
</compile_context>

<pallas_src>
import jax
import jax.numpy as jnp
from jax.experimental import pallas as pl
from jax.experimental.pallas import tpu as pltpu

NUM_ACTIONS = 4   # len(ACTIONS): up / down / left / right
LANE = 128        # TPU vreg lane width


def _qmodel_kernel(xt_ref, w1_ref, b1_ref, alpha_ref, w2_ref, b2_ref, o_ref):
    """One batch tile (batch on lanes): 3 matmuls (MXU) + 2 PReLU (VPU) in VMEM."""
    xt = xt_ref[...]                     # [M, TB]   activations, batch on lanes
    w1 = w1_ref[...]                     # [M, M]    PyTorch [out, in] layout
    b1 = b1_ref[...]                     # [M, 1]    broadcast across lanes
    alpha = alpha_ref[0, 0]              # scalar PReLU slope from SMEM (sreg path)

    # h^T = prelu(W1 @ x^T + b1)
    h = jnp.dot(w1, xt, preferred_element_type=jnp.float32) + b1
    h = jnp.where(h >= 0.0, h, alpha * h)

    # h^T = prelu(W1 @ h^T + b1)   (fc1 reused, exactly as in the PyTorch forward)
    h = jnp.dot(w1, h, preferred_element_type=jnp.float32) + b1
    h = jnp.where(h >= 0.0, h, alpha * h)

    # out^T = W2 @ h^T + b2   -> lane-dense [A, TB] store (no lane padding)
    out = jnp.dot(w2_ref[...], h, preferred_element_type=jnp.float32) + b2_ref[...]
    o_ref[...] = out.astype(o_ref.dtype)


def _round_up(v, m):
    return -(-v // m) * m


def qmodel_forward(x, w1, b1, alpha, w2, b2, *, max_tile_b=2048):
    """x: [B, M] f32. w1: [M, M] (out,in), b1: [M], alpha: scalar,
    w2: [A, M] (out,in), b2: [A].  Returns [B, A] f32."""
    B, M = x.shape
    A = w2.shape[0]

    # ---- batch tiling: batch lives on the lane axis, pad to multiple of 128 ----
    Bp0 = _round_up(B, LANE)
    tile_b = int(min(max_tile_b, Bp0))       # single grid step for B <= max_tile_b
    Bp = _round_up(Bp0, tile_b)
    num_tiles = Bp // tile_b

    # Transposed, lane-dense activations: [M, Bp]
    xt = x.astype(jnp.float32).T
    if Bp != B:
        xt = jnp.pad(xt, ((0, 0), (0, Bp - B)))

    w1_f = w1.astype(jnp.float32)                          # [M, M]
    w2_f = w2.astype(jnp.float32)                          # [A, M]
    b1_2d = b1.reshape(M, 1).astype(jnp.float32)           # [M, 1]
    b2_2d = b2.reshape(A, 1).astype(jnp.float32)           # [A, 1]
    alpha_2d = jnp.asarray(alpha, jnp.float32).reshape(1, 1)   # SMEM scalar

    # Real work only (no padded-lane inflation).
    flops = 4 * Bp * M * M + 2 * Bp * M * A
    bytes_accessed = 4 * (Bp * M + M * M + M + A * M + A + Bp * A)

    grid_spec = pltpu.PrefetchScalarGridSpec(
        num_scalar_prefetch=0,
        grid=(num_tiles,),
        in_specs=[
            pl.BlockSpec((M, tile_b), lambda i: (0, i)),              # x^T tile
            pl.BlockSpec((M, M), lambda i: (0, 0)),                   # w1 (resident)
            pl.BlockSpec((M, 1), lambda i: (0, 0)),                   # b1
            pl.BlockSpec(memory_space=pltpu.MemorySpace.SMEM),        # alpha scalar
            pl.BlockSpec((A, M), lambda i: (0, 0)),                   # w2 (unpadded)
            pl.BlockSpec((A, 1), lambda i: (0, 0)),                   # b2 (unpadded)
        ],
        out_specs=pl.BlockSpec((A, tile_b), lambda i: (0, i)),        # out^T tile
    )

    out_t = pl.pallas_call(
        _qmodel_kernel,
        out_shape=jax.ShapeDtypeStruct((A, Bp), jnp.float32),
        grid_spec=grid_spec,
        compiler_params=pltpu.CompilerParams(
            dimension_semantics=("parallel",),   # independent batch tiles (v7x 2 TCs)
        ),
        cost_estimate=pl.CostEstimate(
            flops=int(flops), transcendentals=0, bytes_accessed=int(bytes_accessed)),
    )(xt, w1_f, b1_2d, alpha_2d, w2_f, b2_2d)

    # Undo the transpose / batch padding outside the kernel.
    return out_t[:, :B].T


def qmodel_reference(x, w1, b1, alpha, w2, b2):
    """Plain JAX reference (PyTorch [out, in] weight layout)."""
    prelu = lambda v: jnp.where(v >= 0.0, v, alpha * v)
    h = prelu(x @ w1.T + b1)
    h = prelu(h @ w1.T + b1)
    return h @ w2.T + b2


if __name__ == "__main__":
    MAZE_SIZE = 16
    BATCH = 256   # batch many states per call; still a single grid step

    key = jax.random.PRNGKey(0)
    k_x, k_w1, k_b1, k_w2, k_b2 = jax.random.split(key, 5)

    # Deterministic parameter init (PyTorch-style uniform bounds), [out, in] layout.
    bound1 = 1.0 / jnp.sqrt(MAZE_SIZE)
    w1 = jax.random.uniform(k_w1, (MAZE_SIZE, MAZE_SIZE), jnp.float32, -bound1, bound1)
    b1 = jax.random.uniform(k_b1, (MAZE_SIZE,), jnp.float32, -bound1, bound1)
    w2 = jax.random.uniform(k_w2, (NUM_ACTIONS, MAZE_SIZE), jnp.float32, -bound1, bound1)
    b2 = jax.random.uniform(k_b2, (NUM_ACTIONS,), jnp.float32, -bound1, bound1)
    alpha = jnp.float32(0.25)  # nn.PReLU() default

    x = jax.random.uniform(k_x, (BATCH, MAZE_SIZE), jnp.float32, 0.0, 1.0)

    out = qmodel_forward(x, w1, b1, alpha, w2, b2)
    out = jax.block_until_ready(out)

    ref = qmodel_reference(x, w1, b1, alpha, w2, b2)
    assert out.shape == (BATCH, NUM_ACTIONS)
    assert jnp.allclose(out, ref, atol=1e-5, rtol=1e-5), "mismatch vs reference"

    print("KERNEL_OK")
</pallas_src>

<mosaic_0001>
module attributes {stable_mosaic.version = 11 : i64} {
  func.func @_qmodel_kernel(%arg0: i32, %arg1: memref<16x256xf32, #tpu.memory_space<vmem>>, %arg2: memref<16x16xf32, #tpu.memory_space<vmem>>, %arg3: memref<16x1xf32, #tpu.memory_space<vmem>>, %arg4: memref<1x1xf32, #tpu.memory_space<smem>>, %arg5: memref<4x16xf32, #tpu.memory_space<vmem>>, %arg6: memref<4x1xf32, #tpu.memory_space<vmem>>, %arg7: memref<4x256xf32, #tpu.memory_space<vmem>>) attributes {dimension_semantics = [#tpu.dimension_semantics<parallel>], iteration_bounds = array<i64: 1>, scalar_prefetch = 0 : i64, scratch_operands = 0 : i64, tpu.core_type = #tpu.core_type<tc>, window_params = [{transform_indices = @transform_0, window_bounds = array<i64: 16, 256>}, {pipeline_mode = #tpu.pipeline_mode<synchronous>, transform_indices = @transform_1, window_bounds = array<i64: 16, 16>}, {pipeline_mode = #tpu.pipeline_mode<synchronous>, transform_indices = @transform_2, window_bounds = array<i64: 16, 1>}, {transform_indices = @transform_3, window_bounds = array<i64: 1, 1>}, {pipeline_mode = #tpu.pipeline_mode<synchronous>, transform_indices = @transform_4, window_bounds = array<i64: 4, 16>}, {pipeline_mode = #tpu.pipeline_mode<synchronous>, transform_indices = @transform_5, window_bounds = array<i64: 4, 1>}, {transform_indices = @transform_6, window_bounds = array<i64: 4, 256>}]} {
    %c0 = arith.constant 0 : index
    %c0_0 = arith.constant 0 : index
    %0 = vector.load %arg1[%c0, %c0_0] : memref<16x256xf32, #tpu.memory_space<vmem>>, vector<16x256xf32>
    %c0_1 = arith.constant 0 : index
    %c0_2 = arith.constant 0 : index
    %1 = vector.load %arg2[%c0_1, %c0_2] : memref<16x16xf32, #tpu.memory_space<vmem>>, vector<16x16xf32>
    %c0_3 = arith.constant 0 : index
    %c0_4 = arith.constant 0 : index
    %2 = vector.load %arg3[%c0_3, %c0_4] : memref<16x1xf32, #tpu.memory_space<vmem>>, vector<16x1xf32>
    %c0_5 = arith.constant 0 : index
    %c0_6 = arith.constant 0 : index
    %3 = memref.load %arg4[%c0_5, %c0_6] : memref<1x1xf32, #tpu.memory_space<smem>>
    %cst = arith.constant dense<0.000000e+00> : vector<16x256xf32>
    %4 = tpu.matmul %1, %0, %cst {dimension_numbers = #tpu.dot_dimension_numbers<[1], [0], [0], [1], [0, 0, 1, 1], [], []>} : vector<16x16xf32>, vector<16x256xf32>, vector<16x256xf32> -> vector<16x256xf32>
    %5 = vector.broadcast %2 : vector<16x1xf32> to vector<16x256xf32>
    %6 = arith.addf %4, %5 : vector<16x256xf32>
    %cst_7 = arith.constant 0.000000e+00 : f32
    %7 = vector.broadcast %cst_7 : f32 to vector<16x256xf32>
    %8 = arith.cmpf oge, %6, %7 : vector<16x256xf32>
    %9 = vector.broadcast %3 : f32 to vector<16x256xf32>
    %10 = arith.mulf %9, %6 : vector<16x256xf32>
    %11 = arith.select %8, %6, %10 : vector<16x256xi1>, vector<16x256xf32>
    %cst_8 = arith.constant dense<0.000000e+00> : vector<16x256xf32>
    %12 = tpu.matmul %1, %11, %cst_8 {dimension_numbers = #tpu.dot_dimension_numbers<[1], [0], [0], [1], [0, 0, 1, 1], [], []>} : vector<16x16xf32>, vector<16x256xf32>, vector<16x256xf32> -> vector<16x256xf32>
    %13 = vector.broadcast %2 : vector<16x1xf32> to vector<16x256xf32>
    %14 = arith.addf %12, %13 : vector<16x256xf32>
    %cst_9 = arith.constant 0.000000e+00 : f32
    %15 = vector.broadcast %cst_9 : f32 to vector<16x256xf32>
    %16 = arith.cmpf oge, %14, %15 : vector<16x256xf32>
    %17 = vector.broadcast %3 : f32 to vector<16x256xf32>
    %18 = arith.mulf %17, %14 : vector<16x256xf32>
    %19 = arith.select %16, %14, %18 : vector<16x256xi1>, vector<16x256xf32>
    %c0_10 = arith.constant 0 : index
    %c0_11 = arith.constant 0 : index
    %20 = vector.load %arg5[%c0_10, %c0_11] : memref<4x16xf32, #tpu.memory_space<vmem>>, vector<4x16xf32>
    %cst_12 = arith.constant dense<0.000000e+00> : vector<4x256xf32>
    %21 = tpu.matmul %20, %19, %cst_12 {dimension_numbers = #tpu.dot_dimension_numbers<[1], [0], [0], [1], [0, 0, 1, 1], [], []>} : vector<4x16xf32>, vector<16x256xf32>, vector<4x256xf32> -> vector<4x256xf32>
    %c0_13 = arith.constant 0 : index
    %c0_14 = arith.constant 0 : index
    %22 = vector.load %arg6[%c0_13, %c0_14] : memref<4x1xf32, #tpu.memory_space<vmem>>, vector<4x1xf32>
    %23 = vector.broadcast %22 : vector<4x1xf32> to vector<4x256xf32>
    %24 = arith.addf %21, %23 : vector<4x256xf32>
    %c0_15 = arith.constant 0 : index
    %c0_16 = arith.constant 0 : index
    %25 = vector.load %arg7[%c0_15, %c0_16] : memref<4x256xf32, #tpu.memory_space<vmem>>, vector<4x256xf32>
    tpu.vector_store %arg7[%c0_15, %c0_16], %24 {strides = array<i32>} : memref<4x256xf32, #tpu.memory_space<vmem>>, vector<4x256xf32>,
    return
  }
  func.func @transform_0(%arg0: i32) -> (i32, i32) {
    %c0_i32 = arith.constant 0 : i32
    %c0_i32_0 = arith.constant 0 : i32
    return %c0_i32, %arg0 : i32, i32
  }
  func.func @transform_1(%arg0: i32) -> (i32, i32) {
    %c0_i32 = arith.constant 0 : i32
    %c0_i32_0 = arith.constant 0 : i32
    %c0_i32_1 = arith.constant 0 : i32
    return %c0_i32, %c0_i32_0 : i32, i32
  }
  func.func @transform_2(%arg0: i32) -> (i32, i32) {
    %c0_i32 = arith.constant 0 : i32
    %c0_i32_0 = arith.constant 0 : i32
    %c0_i32_1 = arith.constant 0 : i32
    return %c0_i32, %c0_i32_0 : i32, i32
  }
  func.func @transform_3(%arg0: i32) -> (i32, i32) {
    %c0_i32 = arith.constant 0 : i32
    %c0_i32_0 = arith.constant 0 : i32
    %c0_i32_1 = arith.constant 0 : i32
    return %c0_i32, %c0_i32_0 : i32, i32
  }
  func.func @transform_4(%arg0: i32) -> (i32, i32) {
    %c0_i32 = arith.constant 0 : i32
    %c0_i32_0 = arith.constant 0 : i32
    %c0_i32_1 = arith.constant 0 : i32
    return %c0_i32, %c0_i32_0 : i32, i32
  }
  func.func @transform_5(%arg0: i32) -> (i32, i32) {
    %c0_i32 = arith.constant 0 : i32
    %c0_i32_0 = arith.constant 0 : i32
    %c0_i32_1 = arith.constant 0 : i32
    return %c0_i32, %c0_i32_0 : i32, i32
  }
  func.func @transform_6(%arg0: i32) -> (i32, i32) {
    %c0_i32 = arith.constant 0 : i32
    %c0_i32_0 = arith.constant 0 : i32
    return %c0_i32, %arg0 : i32, i32
  }
}

</mosaic_0001>

<bundles_post_ra>
// kernel: tpu_custom_call.1
= control target key start
LH: loop header
LB: loop body
LE: loop exit
PB: predicated region body
PF: predicated region fallthrough
CT: control target
= control target key end

     0   :  { %12 = vsyncpa [#allocation4], 0  ;;  %s475_s0 = inlined_call_operand.hbm [shape: f32[16,256], index: 0, kind: input, shape index: {}]   ;;  %s476_s1 = inlined_call_operand.vmem [shape: f32[16,16], index: 1, kind: input, shape index: {}]   ;;  %s477_s2 = inlined_call_operand.vmem [shape: f32[16,1], index: 2, kind: input, shape index: {}]   ;;  %s478_s3 = inlined_call_operand.<no memory space> [shape: f32[1,1], index: 3, kind: input, shape index: {}]   ;;  %s479_s4 = inlined_call_operand.vmem [shape: f32[4,16], index: 4, kind: input, shape index: {}]   ;;  %s480_s5 = inlined_call_operand.vmem [shape: f32[4,1], index: 5, kind: input, shape index: {}]   ;;  %s481_s6 = inlined_call_operand.hbm [shape: f32[4,256], index: 6, kind: output, shape index: {}]  }
   0x1   :  { %13 = vsyncpa [#allocation5], 0  ;;  %s402_s21 = smov [#allocation3]  }
   0x2   :  { %s19_s22 = sshll.u32 %s402_s21, 4  ;;  %s20_s22 = int_to_ptr.vmem [resolvable:$true] %s19_s22 }
   0x3   :  { %s366_s23 = scalar_lea.vmem %s20_s22, 512  ;;  %p371_p1 = scmp.lt.s32.totalorder %s20_s22, %s20_s22 }
   0x4   :  { %p367_p0 = scmp.ne.s32.totalorder %s20_s22, %s366_s23  ;;  %p372_p2 = scmp.lt.s32.totalorder %s366_s23, %s366_s23 }
   0x6   :  { %p373_p3 = por %p372_p2, %p371_p1 }
   0x8   :  { %p374_p4 = pnand %p373_p3, %p367_p0 }
   0xa   :  { %377 = shalt.err (!%p374_p4)
}
   0xb   :  { %s403_s24 = smov 256   ;;  %s404_s25 = smov 16  }
   0xc   :  { %25 = dma.hbm_to_vmem [thread:$0]  %s475_s0, 512, %s20_s22, [#allocation4], %s403_s24, %s403_s24, %s404_s25  }
   0xd   :  { %398 = dma.done.wait [#allocation4], 512  }
   0xe   :  { %399 = vsyncadd [#allocation4], 4294966784  ;;  %v405_v0 = vmov 0.0   ;;  %v406_v1 = vmov 0   ;;  %v42_v2 = vld [vmem:[#allocation3 + $0x18] sm:$0xff]  ;;  %v41_v3 = vld [vmem:[#allocation3 + $0x10] sm:$0xff]  ;;  %v146_v19 = vstv %s478_s3 }
   0xf   :  { %129 = vmatprep.mubr.f32.mxu0 %v405_v0  ;;  %356 = vset.pattern.permute.xlu0 %v406_v1  ;;  %v40_v4 = vld [vmem:[#allocation3 + $0x8] sm:$0xff]  ;;  %v39_v5 = vld [vmem:[#allocation3] sm:$0xff]  ;;  %vm58_vm0 = vcmask 130048   ;;  %s407_s13 = smov [#allocation6]  }
  0x10   :  { %219 = vmatprep.mubr.f32.mxu1 %v405_v0  ;;  %357 = vset.pattern.permute.xlu1 %v406_v1  ;;  %v43_v6 = vld [vmem:[%s476_s1] sm:$0xff]  ;;  %v46_v7 = vld [vmem:[%s477_s2 + $0x8] sm:$0xff]  ;;  %s336_s14 = sshll.u32 %s407_s13, 4  ;;  %s337_s14 = int_to_ptr.vmem [resolvable:$true] %s336_s14 }
  0x11   :  { %93 = vmatprep.subr.mxu0 %v42_v2  ;;  %55 = vperm.xlu0 %356, %v46_v7   ;;  %v45_v8 = vld [vmem:[%s477_s2] sm:$0xff]  ;;  %v44_v9 = vld [vmem:[%s476_s1 + $0x8] sm:$0xff]  ;;  %s378_s15 = scalar_lea.vmem %s337_s14, 128  ;;  %p383_p6 = scmp.lt.s32.totalorder %s337_s14, %s337_s14 }
  0x12   :  { %94 = vmatpush1.msra.mxu0 %v41_v3  ;;  %v245_v29 = vld [vmem:[%s480_s5] sm:$0xf]  ;;  %p379_p5 = scmp.ne.s32.totalorder %s337_s14, %s378_s15  ;;  %p384_p7 = scmp.lt.s32.totalorder %s378_s15, %s378_s15 }
  0x13   :  { %95 = vmatprep.subr.mxu0 %v40_v4  ;;  %248 = vperm.xlu1 %357, %v245_v29   ;;  %v244_v45 = vld [vmem:[%s479_s4] sm:$0xf] }
  0x14   :  { %96 = vmatpush1.msra.mxu0 %v39_v5  ;;  %p385_p8 = por %p384_p7, %p383_p6 }
  0x15   :  { %345 = vmatmul.mubr.msk.f32.vlgmr.msra.gmra.mxu0 %vm58_vm0, %v43_v6  ;;  %50 = vperm.xlu0 %356, %v45_v8  }
  0x16   :  { %135 = vmatprep.mubr.f32.mxu0 %v405_v0  ;;  %p386_p9 = pnand %p385_p8, %p379_p5 }
  0x19   :  { %346 = vmatmul.mubr.msk.f32.gmra.mxu0 %vm58_vm0, %v44_v9 }
  0x1a   :  { %318 = vmatprep.mubr.f32.mxu0 %v405_v0 }
  0x8c   :  { %v56_v10 = vpop.permute.xlu0 %55 }
  0x8e   :  { %v249_v48 = vpop.permute.xlu1 %248 }
  0x90   :  { %v51_v13 = vpop.permute.xlu0 %50 }
  0xd5   :  { %v131_v11 = vpop.f32.mrf.mxu0 }
  0xd6   :  { %v132_v17 = vadd.f32 %v131_v11, %v51_v13 }
  0xd7   :  { %v133_v12 = vpop.f32.mrf.mxu0 }
  0xd8   :  { %v134_v15 = vadd.f32 %v133_v12, %v51_v13  ;;  %v147_v24 = vmul.f32 %v146_v19, %v132_v17  ;;  %vm142_vm4 = vcmp.ge.f32.partialorder %v132_v17, 0.0 }
  0xd9   :  { %v137_v14 = vpop.f32.mrf.mxu0 }
  0xda   :  { %v138_v16 = vadd.f32 %v137_v14, %v56_v10  ;;  %v148_v22 = vmul.f32 %v146_v19, %v134_v15  ;;  %vm143_vm3 = vcmp.ge.f32.partialorder %v134_v15, 0.0  ;;  %v151_v28 = vsel %vm142_vm4, %v132_v17, %v147_v24 }
  0xdb   :  { %v139_v18 = vpop.f32.mrf.mxu0 }
  0xdc   :  { %v140_v20 = vadd.f32 %v139_v18, %v56_v10  ;;  %v149_v21 = vmul.f32 %v146_v19, %v138_v16  ;;  %vm144_vm2 = vcmp.ge.f32.partialorder %v138_v16, 0.0  ;;  %v152_v27 = vsel %vm143_vm3, %v134_v15, %v148_v22 }
  0xde   :  { %vm145_vm1 = vcmp.ge.f32.partialorder %v140_v20, 0.0  ;;  %v150_v23 = vmul.f32 %v146_v19, %v140_v20  ;;  %v153_v26 = vsel %vm144_vm2, %v138_v16, %v149_v21 }
  0xe0   :  { %v154_v25 = vsel %vm145_vm1, %v140_v20, %v150_v23 }
  0xe1   :  { %183 = vmatprep.subr.mxu1 %v154_v25 }
  0xe2   :  { %184 = vmatpush1.msra.mxu1 %v153_v26 }
  0xe3   :  { %185 = vmatprep.subr.mxu1 %v152_v27 }
  0xe4   :  { %186 = vmatpush1.msra.mxu1 %v151_v28 }
  0xe5   :  { %347 = vmatmul.mubr.msk.f32.vlgmr.msra.gmra.mxu1 %vm58_vm0, %v43_v6 }
  0xe6   :  { %225 = vmatprep.mubr.f32.mxu1 %v405_v0 }
  0xe9   :  { %348 = vmatmul.mubr.msk.f32.gmra.mxu1 %vm58_vm0, %v44_v9 }
 0x1a5   :  { %v221_v30 = vpop.f32.mrf.mxu1 }
 0x1a6   :  { %v222_v35 = vadd.f32 %v221_v30, %v51_v13 }
 0x1a7   :  { %v223_v31 = vpop.f32.mrf.mxu1 }
 0x1a8   :  { %v224_v33 = vadd.f32 %v223_v31, %v51_v13  ;;  %v236_v41 = vmul.f32 %v222_v35, %v146_v19  ;;  %vm232_vm8 = vcmp.ge.f32.partialorder %v222_v35, 0.0 }
 0x1a9   :  { %v227_v32 = vpop.f32.mrf.mxu1 }
 0x1aa   :  { %v228_v34 = vadd.f32 %v227_v32, %v56_v10  ;;  %v237_v39 = vmul.f32 %v224_v33, %v146_v19  ;;  %vm233_vm7 = vcmp.ge.f32.partialorder %v224_v33, 0.0  ;;  %v240_v46 = vsel %vm232_vm8, %v222_v35, %v236_v41 }
 0x1ab   :  { %v229_v36 = vpop.f32.mrf.mxu1 }
 0x1ac   :  { %v230_v37 = vadd.f32 %v229_v36, %v56_v10  ;;  %v238_v38 = vmul.f32 %v228_v34, %v146_v19  ;;  %vm234_vm5 = vcmp.ge.f32.partialorder %v228_v34, 0.0  ;;  %v241_v44 = vsel %vm233_vm7, %v224_v33, %v237_v39 }
 0x1ae   :  { %v239_v40 = vmul.f32 %v230_v37, %v146_v19  ;;  %vm235_vm6 = vcmp.ge.f32.partialorder %v230_v37, 0.0  ;;  %v242_v43 = vsel %vm234_vm5, %v228_v34, %v238_v38 }
 0x1b0   :  { %v243_v42 = vsel %vm235_vm6, %v230_v37, %v239_v40 }
 0x1b1   :  { %282 = vmatprep.subr.mxu0 %v243_v42 }
 0x1b2   :  { %283 = vmatpush1.msra.mxu0 %v242_v43 }
 0x1b3   :  { %284 = vmatprep.subr.mxu0 %v241_v44 }
 0x1b4   :  { %285 = vmatpush1.msra.mxu0 %v240_v46 }
 0x1b5   :  { %349 = vmatmul.mubr.msk.f32.vlgmr.msra.gmra.mxu0 %vm58_vm0, %v244_v45 }
 0x275   :  { %v320_v47 = vpop.f32.mrf.mxu0 }
 0x276   :  { %v321_v50 = vadd.f32 %v320_v47, %v249_v48 }
 0x277   :  { %v322_v49 = vpop.f32.mrf.mxu0 }
 0x278   :  { %v323_v51 = vadd.f32 %v322_v49, %v249_v48 }
 0x27a   :  { %v327_v52 = vcombine.low %v321_v50, %v323_v51 }
 0x27c   :  { %329 = vst [vmem:[#allocation6] sm:$0xff] %v327_v52 }
 0x27d   :  { %389 = shalt.err (!%p386_p9)
}
 0x27e   :  { %339 = dma.vmem_to_hbm [thread:$0]  %s337_s14, 128, %s481_s6, [#allocation5]  }
 0x27f   :  { %400 = dma.done.wait [#allocation5], 128  }
 0x280   :  { %401 = vsyncadd [#allocation5], 4294967168 }
 0x281   :  { %343 = vsyncpa [#allocation4], 1 }
 0x282   :  { %344 = vsyncpa [#allocation5], 1 }

</bundles_post_ra>
